<compile_context>
chip_gen: v5e
topology: v5e:2x2
jax: 0.10.0
libtpu: 0.0.40
codegen_flags: <defaults>
</compile_context>

<pallas_src>
import functools

import jax
import jax.numpy as jnp
from jax.experimental import pallas as pl
from jax.experimental.pallas import tpu as pltpu


def _conv_bn_relu_kernel(p_ref, w_ref, b_ref, o_ref, *, has_relu):
    # p_ref: (Kc, tL)   im2col patches, batch merged into lanes (bf16)
    # w_ref: (Cout, Kc) BN-scale-folded conv weights (bf16)
    # b_ref: (Cout, 1)  folded bias (f32)
    # o_ref: (Cout, tL) output block (lane-dense)
    acc = jax.lax.dot_general(
        w_ref[...], p_ref[...],
        dimension_numbers=(((1,), (0,)), ((), ())),
        preferred_element_type=jnp.float32)               # (Cout, tL) f32 MXU accum
    out = acc + b_ref[...]                                 # single broadcast per step
    if has_relu:
        out = jnp.maximum(out, 0.0)
    o_ref[...] = out.astype(o_ref.dtype)


def _num_lane_blocks(total_lanes):
    """2 parallel blocks on v7x (2 TensorCores/chip), 1 block on v5e/v6e."""
    try:
        kind = jax.devices()[0].device_kind.lower()
    except Exception:  # pragma: no cover - defensive
        kind = ""
    want = 2 if "v7" in kind else 1
    if want > 1 and (total_lanes % (want * 128) != 0):
        want = 1
    return want


def conv_bn_relu(x_nchw, weight_oihw, gamma, beta, running_mean, running_var,
                 *, stride=1, pad=1, bn_eps=1e-5, has_bn=True, has_relu=True,
                 conv_bias=None, compute_dtype=jnp.bfloat16,
                 out_dtype=jnp.float32, lane_blocks=None):
    """ConvBnRelu forward. x_nchw: (N, Cin, H, W); weight_oihw: (Cout, Cin, KH, KW).

    Eval-mode BatchNorm (running stats) folded into the conv weights/bias.
    """
    assert stride == 1, "this kernel implements stride=1 (module instance uses stride=1)"
    N, Cin, H, W = x_nchw.shape
    Cout, Cin_w, KH, KW = weight_oihw.shape
    assert Cin_w == Cin, "groups=1 only"
    H_out = H + 2 * pad - (KH - 1)
    W_out = W + 2 * pad - (KW - 1)
    M = H_out * W_out
    L = N * M                      # merged batch*spatial lane axis
    Kc = KH * KW * Cin

    # ---- fold BN (and optional conv bias) into weights & bias -------------
    if has_bn:
        scale = gamma / jnp.sqrt(running_var + bn_eps)              # (Cout,)
        bias = beta - running_mean * scale                          # (Cout,)
    else:
        scale = jnp.ones((Cout,), jnp.float32)
        bias = jnp.zeros((Cout,), jnp.float32)
    if conv_bias is not None:
        bias = bias + conv_bias.astype(jnp.float32) * scale
    w_folded = weight_oihw.astype(jnp.float32) * scale[:, None, None, None]
    # K index = (kh*KW + kw)*Cin + cin  (must match the patch stacking below)
    w2d = jnp.transpose(w_folded, (0, 2, 3, 1)).reshape(Cout, Kc).astype(compute_dtype)
    bias2d = bias.astype(jnp.float32).reshape(Cout, 1)
    # Note: Kc=36 equals the full array dim so the block is already legal; padding
    # Kc->48 (full bf16 sublane pack) only if a bundle dump shows relayout copies.

    # ---- im2col with batch merged into the lane axis (bf16 before pad) ----
    x_c = jnp.transpose(x_nchw.astype(compute_dtype), (1, 0, 2, 3))  # (Cin, N, H, W)
    x_pad = jnp.pad(x_c, ((0, 0), (0, 0), (pad, pad), (pad, pad)))
    taps = []
    for kh in range(KH):
        for kw in range(KW):
            taps.append(x_pad[:, :, kh:kh + H_out, kw:kw + W_out])   # (Cin, N, Ho, Wo)
    # (KH*KW, Cin, N, Ho, Wo) -> (Kc, N*M); K index = tap*Cin + cin, lane = n*M + m
    patches = jnp.stack(taps, axis=0).reshape(Kc, L)

    # ---- grid: 1 block (v5e/v6e) or 2 parallel blocks (v7x, one per TC) ----
    nb = lane_blocks if lane_blocks is not None else _num_lane_blocks(L)
    assert L % nb == 0 and (L // nb) % 128 == 0, "lane block must be a multiple of 128"
    tL = L // nb

    kernel = functools.partial(_conv_bn_relu_kernel, has_relu=has_relu)

    out_flat = pl.pallas_call(
        kernel,
        out_shape=jax.ShapeDtypeStruct((Cout, L), out_dtype),
        grid_spec=pltpu.PrefetchScalarGridSpec(
            num_scalar_prefetch=0,
            grid=(nb,),
            in_specs=[
                pl.BlockSpec((Kc, tL), lambda i: (0, i)),
                pl.BlockSpec((Cout, Kc), lambda i: (0, 0)),
                pl.BlockSpec((Cout, 1), lambda i: (0, 0)),
            ],
            out_specs=pl.BlockSpec((Cout, tL), lambda i: (0, i)),
        ),
        compiler_params=pltpu.CompilerParams(dimension_semantics=("parallel",)),
    )(patches, w2d, bias2d)

    # (Cout, N*M) -> (N, Cout, H, W); tiny XLA transpose in the wrapper.
    return jnp.transpose(out_flat.reshape(Cout, N, H_out, W_out), (1, 0, 2, 3))


if __name__ == "__main__":
    # ConvBnRelu(in_planes=4, out_planes=8, ksize=3, stride=1, pad=1)
    N, Cin, H, W = 2, 4, 16, 16
    Cout, K = 8, 3
    bn_eps = 1e-5

    key = jax.random.PRNGKey(0)
    kx, kw, kg, kb, km, kv = jax.random.split(key, 6)

    x = jax.random.normal(kx, (N, Cin, H, W), dtype=jnp.float32)
    weight = jax.random.normal(kw, (Cout, Cin, K, K), dtype=jnp.float32) * 0.1
    gamma = 1.0 + 0.1 * jax.random.normal(kg, (Cout,), dtype=jnp.float32)
    beta = 0.1 * jax.random.normal(kb, (Cout,), dtype=jnp.float32)
    running_mean = 0.1 * jax.random.normal(km, (Cout,), dtype=jnp.float32)
    running_var = jnp.abs(1.0 + 0.1 * jax.random.normal(kv, (Cout,), dtype=jnp.float32))

    out = conv_bn_relu(x, weight, gamma, beta, running_mean, running_var,
                       stride=1, pad=1, bn_eps=bn_eps, has_relu=True)
    out = jax.block_until_ready(out)
    assert out.shape == (N, Cout, H, W)

    # ---- references -------------------------------------------------------
    scale = gamma / jnp.sqrt(running_var + bn_eps)
    bias = beta - running_mean * scale

    # (a) exact-operand reference: same bf16 rounding of operands as the kernel,
    #     f32 accumulation -> differences are only summation-order ulps.
    x_bf = x.astype(jnp.bfloat16).astype(jnp.float32)
    w_folded_bf = (weight * scale[:, None, None, None]).astype(jnp.bfloat16).astype(jnp.float32)
    ref_bf = jax.lax.conv_general_dilated(
        x_bf, w_folded_bf, window_strides=(1, 1), padding=((1, 1), (1, 1)),
        dimension_numbers=("NCHW", "OIHW", "NCHW"))
    ref_bf = jnp.maximum(ref_bf + bias[None, :, None, None], 0.0)
    assert jnp.allclose(out, ref_bf, atol=1e-3, rtol=1e-3), "mismatch vs bf16-operand reference"

    # (b) full-f32 module reference with a loose tolerance (bf16 operand quantization).
    ref = jax.lax.conv_general_dilated(
        x, weight, window_strides=(1, 1), padding=((1, 1), (1, 1)),
        dimension_numbers=("NCHW", "OIHW", "NCHW"))
    ref = jnp.maximum(ref * scale[None, :, None, None] + bias[None, :, None, None], 0.0)
    assert jnp.allclose(out, ref, atol=3e-2, rtol=3e-2), "mismatch vs f32 reference"

    print("KERNEL_OK")
</pallas_src>

<mosaic_0001>
module attributes {stable_mosaic.version = 11 : i64} {
  func.func @_conv_bn_relu_kernel(%arg0: i32, %arg1: memref<36x512xbf16, #tpu.memory_space<vmem>>, %arg2: memref<8x36xbf16, #tpu.memory_space<vmem>>, %arg3: memref<8x1xf32, #tpu.memory_space<vmem>>, %arg4: memref<8x512xf32, #tpu.memory_space<vmem>>) attributes {dimension_semantics = [#tpu.dimension_semantics<parallel>], iteration_bounds = array<i64: 1>, scalar_prefetch = 0 : i64, scratch_operands = 0 : i64, tpu.core_type = #tpu.core_type<tc>, window_params = [{transform_indices = @transform_0, window_bounds = array<i64: 36, 512>}, {pipeline_mode = #tpu.pipeline_mode<synchronous>, transform_indices = @transform_1, window_bounds = array<i64: 8, 36>}, {pipeline_mode = #tpu.pipeline_mode<synchronous>, transform_indices = @transform_2, window_bounds = array<i64: 8, 1>}, {transform_indices = @transform_3, window_bounds = array<i64: 8, 512>}]} {
    %c0 = arith.constant 0 : index
    %c0_0 = arith.constant 0 : index
    %0 = vector.load %arg2[%c0, %c0_0] : memref<8x36xbf16, #tpu.memory_space<vmem>>, vector<8x36xbf16>
    %c0_1 = arith.constant 0 : index
    %c0_2 = arith.constant 0 : index
    %1 = vector.load %arg1[%c0_1, %c0_2] : memref<36x512xbf16, #tpu.memory_space<vmem>>, vector<36x512xbf16>
    %cst = arith.constant dense<0.000000e+00> : vector<8x512xf32>
    %2 = tpu.matmul %0, %1, %cst {dimension_numbers = #tpu.dot_dimension_numbers<[1], [0], [0], [1], [0, 0, 1, 1], [], []>} : vector<8x36xbf16>, vector<36x512xbf16>, vector<8x512xf32> -> vector<8x512xf32>
    %c0_3 = arith.constant 0 : index
    %c0_4 = arith.constant 0 : index
    %3 = vector.load %arg3[%c0_3, %c0_4] : memref<8x1xf32, #tpu.memory_space<vmem>>, vector<8x1xf32>
    %4 = vector.broadcast %3 : vector<8x1xf32> to vector<8x512xf32>
    %5 = arith.addf %2, %4 : vector<8x512xf32>
    %cst_5 = arith.constant 0.000000e+00 : f32
    %6 = vector.broadcast %cst_5 : f32 to vector<8x512xf32>
    %7 = arith.maximumf %5, %6 : vector<8x512xf32>
    %c0_6 = arith.constant 0 : index
    %c0_7 = arith.constant 0 : index
    %8 = vector.load %arg4[%c0_6, %c0_7] : memref<8x512xf32, #tpu.memory_space<vmem>>, vector<8x512xf32>
    tpu.vector_store %arg4[%c0_6, %c0_7], %7 {strides = array<i32>} : memref<8x512xf32, #tpu.memory_space<vmem>>, vector<8x512xf32>,
    return
  }
  func.func @transform_0(%arg0: i32) -> (i32, i32) {
    %c0_i32 = arith.constant 0 : i32
    %c0_i32_0 = arith.constant 0 : i32
    return %c0_i32, %arg0 : i32, i32
  }
  func.func @transform_1(%arg0: i32) -> (i32, i32) {
    %c0_i32 = arith.constant 0 : i32
    %c0_i32_0 = arith.constant 0 : i32
    %c0_i32_1 = arith.constant 0 : i32
    return %c0_i32, %c0_i32_0 : i32, i32
  }
  func.func @transform_2(%arg0: i32) -> (i32, i32) {
    %c0_i32 = arith.constant 0 : i32
    %c0_i32_0 = arith.constant 0 : i32
    %c0_i32_1 = arith.constant 0 : i32
    return %c0_i32, %c0_i32_0 : i32, i32
  }
  func.func @transform_3(%arg0: i32) -> (i32, i32) {
    %c0_i32 = arith.constant 0 : i32
    %c0_i32_0 = arith.constant 0 : i32
    return %c0_i32, %arg0 : i32, i32
  }
}

</mosaic_0001>

<bundles_post_ra>
// kernel: tpu_custom_call.1
= control target key start
LH: loop header
LB: loop body
LE: loop exit
PB: predicated region body
PF: predicated region fallthrough
CT: control target
= control target key end

     0   :  { %8 = vsyncpa [#allocation3], 0  ;;  %s336_s0 = inlined_call_operand.hbm [shape: bf16[36,512], index: 0, kind: input, shape index: {}]   ;;  %s337_s1 = inlined_call_operand.vmem [shape: bf16[8,36], index: 1, kind: input, shape index: {}]   ;;  %s338_s2 = inlined_call_operand.vmem [shape: f32[8,1], index: 2, kind: input, shape index: {}]   ;;  %s339_s3 = inlined_call_operand.hbm [shape: f32[8,512], index: 3, kind: output, shape index: {}]  }
   0x1   :  { %9 = vsyncpa [#allocation4], 0  ;;  %s14_s14 = sshll.u32 %s336_s0, 4  ;;  %s295_s15 = smov [#allocation2]   ;;  %s15_s14 = int_to_ptr.hbm [resolvable:$true] %s14_s14 }
   0x2   :  { %s16_s16 = sshll.u32 %s295_s15, 4  ;;  %s296_s17 = smov 256   ;;  %s17_s16 = int_to_ptr.vmem [resolvable:$true] %s16_s16 }
   0x3   :  { %s297_s18 = smov 16  }
   0x4   :  { %22 = dma.hbm_to_vmem [thread:$0]  %s15_s14, 1280, %s17_s16, [#allocation3], %s296_s17, %s296_s17, %s297_s18  }
   0x5   :  { %291 = dma.done.wait [#allocation3], 1280  }
   0x6   :  { %292 = vsyncadd [#allocation3], 4294966016  ;;  %v298_v0 = vmov 0   ;;  %v41_v1 = vld [vmem:[#allocation2 + $0x40] sm:$0x33]  ;;  %vm103_vm0 = vcmask 1041408  }
   0x7   :  { %242 = vset.pattern.permute.xlu0 %v298_v0  ;;  %v42_v2 = vld [vmem:[#allocation2 + $0x48] sm:$0x33]  ;;  %v75_v3 = vunpack.c.l.b16 %v41_v1  ;;  %v76_v4 = vunpack.c.h.b16 %v41_v1  ;;  %v211_v7 = vld [vmem:[#allocation2 + $0x20] sm:$0xf]  ;;  %v235_v8 = vld [vmem:[#allocation2 + $0x2c] sm:$0xf0] }
   0x8   :  { %v77_v5 = vunpack.c.l.b16 %v42_v2  ;;  %v78_v6 = vunpack.c.h.b16 %v42_v2  ;;  %v233_v13 = vld [vmem:[#allocation2 + $0x24] sm:$0xf]  ;;  %v213_v14 = vld [vmem:[#allocation2 + $0x30] sm:$0xf0]  ;;  %v219_v15 = vld [vmem:[#allocation2 + $0x28] sm:$0xf]  ;;  %v212_v23 = vor.u32 %v235_v8, %v211_v7 }
   0x9   :  { %v87_v9 = vpack.c.b16 %v75_v3, %v75_v3  ;;  %v88_v10 = vpack.c.b16 %v76_v4, %v76_v4  ;;  %v236_v16 = vld [vmem:[#allocation2 + $0x34] sm:$0xf0]  ;;  %v234_v17 = vld [vmem:[#allocation2 + $0x2c] sm:$0xf]  ;;  %v221_v18 = vld [vmem:[#allocation2 + $0x38] sm:$0xf0]  ;;  %v216_v24 = vor.u32 %v233_v13, %v213_v14 }
   0xa   :  { %v89_v11 = vpack.c.b16 %v77_v5, %v77_v5  ;;  %v90_v12 = vpack.c.b16 %v78_v6, %v78_v6  ;;  %v195_v25 = vld [vmem:[#allocation2] sm:$0xf]  ;;  %v231_v26 = vld [vmem:[#allocation2 + $0xc] sm:$0xf0]  ;;  %v229_v27 = vld [vmem:[#allocation2 + $0x4] sm:$0xf]  ;;  %v220_v28 = vor.u32 %v236_v16, %v219_v15  ;;  %v224_v29 = vor.u32 %v234_v17, %v221_v18 }
   0xb   :  { %v105_v19 = vsel %vm103_vm0, %v87_v9, 0  ;;  %v108_v20 = vsel %vm103_vm0, %v88_v10, 0  ;;  %v197_v30 = vld [vmem:[#allocation2 + $0x10] sm:$0xf0]  ;;  %v203_v31 = vld [vmem:[#allocation2 + $0x8] sm:$0xf]  ;;  %v196_v36 = vor.u32 %v231_v26, %v195_v25 }
   0xc   :  { %v111_v21 = vsel %vm103_vm0, %v89_v11, 0  ;;  %v114_v22 = vsel %vm103_vm0, %v90_v12, 0  ;;  %121 = vmatpush.bf16.msra.mxu0 %v105_v19  ;;  %134 = vmatpush.bf16.msra.mxu1 %v108_v20  ;;  %v43_v32 = vld [vmem:[%s338_s2] sm:$0xff]  ;;  %v232_v33 = vld [vmem:[#allocation2 + $0x14] sm:$0xf0]  ;;  %v200_v37 = vor.u32 %v229_v27, %v197_v30  ;;  %vm99_vm1 = vcmask 293888  }
   0xd   :  { %147 = vmatpush.bf16.msra.mxu2 %v111_v21  ;;  %160 = vmatpush.bf16.msra.mxu3 %v114_v22  ;;  %v230_v34 = vld [vmem:[#allocation2 + $0xc] sm:$0xf]  ;;  %v205_v35 = vld [vmem:[#allocation2 + $0x18] sm:$0xf0]  ;;  %v204_v38 = vor.u32 %v232_v33, %v203_v31  ;;  %v32_v40 = vld [vmem:[%s337_s1] sm:$0xf] }
   0xe   :  { %46 = vperm.xlu0 %242, %v43_v32   ;;  %v208_v39 = vor.u32 %v230_v34, %v205_v35  ;;  %s299_s1 = smov [#allocation5]   ;;  %s183_s24 = sshll.u32 %s339_s3, 4  ;;  %s184_s24 = int_to_ptr.hbm [resolvable:$true] %s183_s24 }
   0xf   :  { %s181_s2 = sshll.u32 %s299_s1, 4  ;;  %s182_s2 = int_to_ptr.vmem [resolvable:$true] %s181_s2 }
  0x10   :  { %122 = vmatpush.bf16.msra.mxu0 %v212_v23  ;;  %135 = vmatpush.bf16.msra.mxu1 %v216_v24 }
  0x11   :  { %148 = vmatpush.bf16.msra.mxu2 %v220_v28  ;;  %161 = vmatpush.bf16.msra.mxu3 %v224_v29 }
  0x14   :  { %123 = vmatpush.bf16.msra.mxu0 %v196_v36  ;;  %136 = vmatpush.bf16.msra.mxu1 %v200_v37 }
  0x15   :  { %149 = vmatpush.bf16.msra.mxu2 %v204_v38  ;;  %162 = vmatpush.bf16.msra.mxu3 %v208_v39 }
  0x17   :  { %225 = vmatmul.msk.bf16.vlgmr.msra.gmra.mxu0 %vm99_vm1, %v32_v40  ;;  %226 = vmatmul.msk.bf16.vlgmr.msra.gmra.mxu1 %vm99_vm1, %v32_v40 }
  0x18   :  { %227 = vmatmul.msk.bf16.vlgmr.msra.gmra.mxu2 %vm99_vm1, %v32_v40  ;;  %228 = vmatmul.msk.bf16.vlgmr.msra.gmra.mxu3 %vm99_vm1, %v32_v40 }
  0x80   :  { %v47_v41 = vpop.permute.xlu0 %46 }
  0x94   :  { %v125_v42 = vpop.f32.mrf.mxu0  ;;  %v138_v43 = vpop.f32.mrf.mxu1 }
  0x95   :  { %v126_v44 = vadd.f32 %v125_v42, %v47_v41  ;;  %v139_v45 = vadd.f32 %v138_v43, %v47_v41 }
  0x97   :  { %v168_v46 = vmax.f32 %v126_v44, 0.0  ;;  %v169_v47 = vmax.f32 %v139_v45, 0.0 }
  0x99   :  { %172 = vst [vmem:[#allocation5] sm:$0xff] %v168_v46 }
  0x9a   :  { %173 = vst [vmem:[#allocation5 + $0x8] sm:$0xff] %v169_v47 }
  0x9b   :  { %v151_v48 = vpop.f32.mrf.mxu2  ;;  %v164_v49 = vpop.f32.mrf.mxu3 }
  0x9c   :  { %v152_v50 = vadd.f32 %v151_v48, %v47_v41  ;;  %v165_v51 = vadd.f32 %v164_v49, %v47_v41  ;;  %v127_v52 = vpop.f32.mrf.mxu0  ;;  %v140_v53 = vpop.f32.mrf.mxu1 }
  0x9e   :  { %v170_v54 = vmax.f32 %v152_v50, 0.0  ;;  %v171_v55 = vmax.f32 %v165_v51, 0.0 }
  0xa0   :  { %174 = vst [vmem:[#allocation5 + $0x10] sm:$0xff] %v170_v54 }
  0xa1   :  { %175 = vst [vmem:[#allocation5 + $0x18] sm:$0xff] %v171_v55 }
  0xa2   :  { %186 = dma.vmem_to_hbm [thread:$0]  %s182_s2, 512, %s184_s24, [#allocation4]  }
  0xa3   :  { %v153_v56 = vpop.f32.mrf.mxu2  ;;  %v166_v57 = vpop.f32.mrf.mxu3 }
  0xa4   :  { %293 = dma.done.wait [#allocation4], 512  }
  0xa5   :  { %294 = vsyncadd [#allocation4], 4294966784 }
  0xa6   :  { %191 = vsyncpa [#allocation3], 1 }
  0xa7   :  { %192 = vsyncpa [#allocation4], 1 }

</bundles_post_ra>
